<compile_context>
chip_gen: v5e
topology: v5e:2x2
jax: 0.10.0
libtpu: 0.0.40
codegen_flags: <defaults>
</compile_context>

<pallas_src>
import functools

import jax
import jax.numpy as jnp
from jax.experimental import pallas as pl
from jax.experimental.pallas import tpu as pltpu


def _round_up(x, m):
    return ((x + m - 1) // m) * m


def _ffn_residual_kernel(x_ref, w1_ref, b1_ref, w2_ref, b2_ref, o_ref):
    """y = GELU(x @ W1 + b1) @ W2 + b2 + x   for one tile of tokens.

    Matmuls run in bf16 on the MXU with f32 accumulation; GELU, bias adds and
    the residual add stay in f32.
    """
    x_f32 = x_ref[...].astype(jnp.float32)

    # First matmul: (tile_n, C) @ (C, Cm) -> f32 accumulator.
    h = jnp.dot(x_f32.astype(jnp.bfloat16), w1_ref[...],
                preferred_element_type=jnp.float32)
    h = h + b1_ref[...].astype(jnp.float32)
    h = jax.nn.gelu(h, approximate=True)   # tanh-approx -> EUP slot

    # Second matmul: (tile_n, Cm) @ (Cm, C) -> f32 accumulator.
    y = jnp.dot(h.astype(jnp.bfloat16), w2_ref[...],
                preferred_element_type=jnp.float32)
    y = y + b2_ref[...].astype(jnp.float32)

    o_ref[...] = (y + x_f32).astype(o_ref.dtype)


def ffn_residual(x_tokens, w1, b1, w2, b2, *, tile_n=256):
    """x_tokens: (N, C) float32. Returns (N, C) = FFN(x) + x.

    Weights are cast/stored bf16; biases f32. Tail tokens are handled by
    zero-padding N up to a multiple of the tile size and slicing afterwards.
    """
    N, C = x_tokens.shape
    Cm = w1.shape[1]
    assert tile_n % 8 == 0

    # Defensive reshape so biases are always 2-D (1, Cm)/(1, C).
    b1 = jnp.asarray(b1, jnp.float32).reshape(1, Cm)
    b2 = jnp.asarray(b2, jnp.float32).reshape(1, C)
    w1 = jnp.asarray(w1, jnp.bfloat16)
    w2 = jnp.asarray(w2, jnp.bfloat16)

    # Don't over-pad tiny token counts; keep the tile a multiple of 8 sublanes.
    tile = min(tile_n, _round_up(N, 8))
    n_tiles = pl.cdiv(N, tile)
    n_pad = n_tiles * tile
    x_in = x_tokens if n_pad == N else jnp.pad(x_tokens, ((0, n_pad - N), (0, 0)))

    # Advisory cost estimate: 2 matmuls (2*M*K*N flops each) + tanh per hidden elem.
    cost = pl.CostEstimate(
        flops=4 * n_pad * C * Cm,
        transcendentals=n_pad * Cm,
        bytes_accessed=(2 * n_pad * C * 4          # x in + out (f32)
                        + 2 * C * Cm * 2           # W1 + W2 (bf16)
                        + (C + Cm) * 4),           # biases (f32)
    )

    out = pl.pallas_call(
        _ffn_residual_kernel,
        out_shape=jax.ShapeDtypeStruct((n_pad, C), x_tokens.dtype),
        grid=(n_tiles,),
        in_specs=[
            # Token tile: pipelined (double-buffered) over the grid.
            pl.BlockSpec((tile, C), lambda i: (i, 0)),
            # Grid-invariant weights / biases: whole array, resident in VMEM,
            # single-buffered (no pipeline double-buffer).
            pl.BlockSpec(memory_space=pltpu.MemorySpace.VMEM),   # W1 (C, Cm) bf16
            pl.BlockSpec(memory_space=pltpu.MemorySpace.VMEM),   # b1 (1, Cm) f32
            pl.BlockSpec(memory_space=pltpu.MemorySpace.VMEM),   # W2 (Cm, C) bf16
            pl.BlockSpec(memory_space=pltpu.MemorySpace.VMEM),   # b2 (1, C)  f32
        ],
        out_specs=pl.BlockSpec((tile, C), lambda i: (i, 0)),
        compiler_params=pltpu.CompilerParams(
            dimension_semantics=("parallel",),        # shards tiles across v7x's 2 TCs
            vmem_limit_bytes=48 * 1024 * 1024,        # explicit: > scoped defaults, < v7x physical
        ),
        cost_estimate=cost,
    )(x_in, w1, b1, w2, b2)

    return out if n_pad == N else out[:N]


def image_forward(vision_feats, ob_is_padding, params, *, tile_n=256):
    """
    vision_feats: (B, T, C, H, W) float32
    ob_is_padding: (B, T) bool
    Returns dict {'tokens': (B, T*H*W, C), 'is_padding': (B, T*H*W)}
    """
    B, T, C, H, W = vision_feats.shape
    # select=':' -> keep everything.
    # rearrange 'b t c h w -> (b t) (h w) c'  (layout change left to XLA; see header TODO).
    x = jnp.transpose(vision_feats, (0, 1, 3, 4, 2)).reshape(B * T, H * W, C)
    m = x.shape[1]                       # = H*W   (pooling = identity)

    # post_ffn(x) + x  (hot path -> Pallas kernel over flattened tokens)
    x_flat = x.reshape(B * T * m, C)
    y_flat = ffn_residual(x_flat, params["w1"], params["b1"],
                          params["w2"], params["b2"], tile_n=tile_n)

    # is_padding = repeat(ob_is_padding, 'b t -> b (t m)', m=m)
    is_padding = jnp.broadcast_to(ob_is_padding[:, :, None], (B, T, m)).reshape(B, T * m)
    # rearrange '(b t) m c -> b (t m) c'
    tokens = y_flat.reshape(B, T * m, C)
    # aggregate_layer is None -> done.
    return {"tokens": tokens, "is_padding": is_padding}


def init_params(hidsize, mult=2, key=jax.random.PRNGKey(42)):
    k1, k2 = jax.random.split(key)
    # Weights stored bf16 in HBM (MXU-native input rate, halved weight traffic/footprint).
    w1 = (jax.random.normal(k1, (hidsize, hidsize * mult), jnp.float32) * 0.02).astype(jnp.bfloat16)
    w2 = (jax.random.normal(k2, (hidsize * mult, hidsize), jnp.float32) * 0.02).astype(jnp.bfloat16)
    b1 = jnp.zeros((1, hidsize * mult), jnp.float32)
    b2 = jnp.zeros((1, hidsize), jnp.float32)
    return {"w1": w1, "b1": b1, "w2": w2, "b2": b2}


def _ffn_residual_ref(x, w1, b1, w2, b2):
    """Pure-JAX reference with matching bf16 matmul inputs / f32 accumulation."""
    xf = x.astype(jnp.float32)
    h = jnp.dot(xf.astype(jnp.bfloat16), w1.astype(jnp.bfloat16),
                preferred_element_type=jnp.float32) + b1.reshape(1, -1)
    h = jax.nn.gelu(h, approximate=True)
    y = jnp.dot(h.astype(jnp.bfloat16), w2.astype(jnp.bfloat16),
                preferred_element_type=jnp.float32) + b2.reshape(1, -1)
    return (y + xf).astype(x.dtype)


if __name__ == "__main__":
    # hidsize = 128 keeps the output lane-dense (C multiple of 128).
    B, T, C, H, W = 2, 2, 128, 4, 4
    key = jax.random.PRNGKey(0)
    kx, _ = jax.random.split(key)
    vision_feats = jax.random.normal(kx, (B, T, C, H, W), jnp.float32)
    ob_is_padding = jnp.zeros((B, T), dtype=jnp.bool_).at[1, 1].set(True)

    params = init_params(C, mult=2)
    fwd = jax.jit(functools.partial(image_forward, tile_n=256))
    out = fwd(vision_feats, ob_is_padding, params)
    jax.block_until_ready(out["tokens"])
    jax.block_until_ready(out["is_padding"])

    # Shape checks.
    assert out["tokens"].shape == (B, T * H * W, C)
    assert out["is_padding"].shape == (B, T * H * W)

    # Numerical check against a pure-JAX reference of the same math.
    x_flat = jnp.transpose(vision_feats, (0, 1, 3, 4, 2)).reshape(B * T * H * W, C)
    ref = _ffn_residual_ref(x_flat, params["w1"], params["b1"],
                            params["w2"], params["b2"]).reshape(B, T * H * W, C)
    max_err = float(jnp.max(jnp.abs(out["tokens"] - ref)))
    assert max_err < 5e-2, f"max abs err {max_err}"

    print("KERNEL_OK")
</pallas_src>

<mosaic_0001>
module attributes {stable_mosaic.version = 11 : i64} {
  func.func @_ffn_residual_kernel(%arg0: i32, %arg1: memref<64x128xf32, #tpu.memory_space<vmem>>, %arg2: memref<128x256xbf16, #tpu.memory_space<vmem>>, %arg3: memref<1x256xf32, #tpu.memory_space<vmem>>, %arg4: memref<256x128xbf16, #tpu.memory_space<vmem>>, %arg5: memref<1x128xf32, #tpu.memory_space<vmem>>, %arg6: memref<64x128xf32, #tpu.memory_space<vmem>>) attributes {dimension_semantics = [#tpu.dimension_semantics<parallel>], iteration_bounds = array<i64: 1>, scalar_prefetch = 0 : i64, scratch_operands = 0 : i64, tpu.core_type = #tpu.core_type<tc>, window_params = [{transform_indices = @transform_0, window_bounds = array<i64: 64, 128>}, {pipeline_mode = #tpu.pipeline_mode<synchronous>, transform_indices = @transform_1, window_bounds = array<i64: 128, 256>}, {pipeline_mode = #tpu.pipeline_mode<synchronous>, transform_indices = @transform_2, window_bounds = array<i64: 1, 256>}, {pipeline_mode = #tpu.pipeline_mode<synchronous>, transform_indices = @transform_3, window_bounds = array<i64: 256, 128>}, {pipeline_mode = #tpu.pipeline_mode<synchronous>, transform_indices = @transform_4, window_bounds = array<i64: 1, 128>}, {transform_indices = @transform_5, window_bounds = array<i64: 64, 128>}]} {
    %c0 = arith.constant 0 : index
    %c0_0 = arith.constant 0 : index
    %0 = vector.load %arg1[%c0, %c0_0] : memref<64x128xf32, #tpu.memory_space<vmem>>, vector<64x128xf32>
    %1 = arith.truncf %0 : vector<64x128xf32> to vector<64x128xbf16>
    %c0_1 = arith.constant 0 : index
    %c0_2 = arith.constant 0 : index
    %2 = vector.load %arg2[%c0_1, %c0_2] : memref<128x256xbf16, #tpu.memory_space<vmem>>, vector<128x256xbf16>
    %cst = arith.constant dense<0.000000e+00> : vector<64x256xf32>
    %3 = tpu.matmul %1, %2, %cst {dimension_numbers = #tpu.dot_dimension_numbers<[1], [0], [0], [1], [0, 0, 1, 1], [], []>} : vector<64x128xbf16>, vector<128x256xbf16>, vector<64x256xf32> -> vector<64x256xf32>
    %c0_3 = arith.constant 0 : index
    %c0_4 = arith.constant 0 : index
    %4 = vector.load %arg3[%c0_3, %c0_4] : memref<1x256xf32, #tpu.memory_space<vmem>>, vector<1x256xf32>
    %5 = vector.broadcast %4 : vector<1x256xf32> to vector<64x256xf32>
    %6 = arith.addf %3, %5 : vector<64x256xf32>
    %7 = arith.mulf %6, %6 : vector<64x256xf32>
    %8 = arith.mulf %6, %7 : vector<64x256xf32>
    %cst_5 = arith.constant 4.471500e-02 : f32
    %9 = vector.broadcast %cst_5 : f32 to vector<64x256xf32>
    %10 = arith.mulf %9, %8 : vector<64x256xf32>
    %11 = arith.addf %6, %10 : vector<64x256xf32>
    %cst_6 = arith.constant 0.797884583 : f32
    %12 = vector.broadcast %cst_6 : f32 to vector<64x256xf32>
    %13 = arith.mulf %12, %11 : vector<64x256xf32>
    %14 = math.tanh %13 : vector<64x256xf32>
    %cst_7 = arith.constant 1.000000e+00 : f32
    %15 = vector.broadcast %cst_7 : f32 to vector<64x256xf32>
    %16 = arith.addf %15, %14 : vector<64x256xf32>
    %cst_8 = arith.constant 5.000000e-01 : f32
    %17 = vector.broadcast %cst_8 : f32 to vector<64x256xf32>
    %18 = arith.mulf %17, %16 : vector<64x256xf32>
    %19 = arith.mulf %6, %18 : vector<64x256xf32>
    %20 = arith.truncf %19 : vector<64x256xf32> to vector<64x256xbf16>
    %c0_9 = arith.constant 0 : index
    %c0_10 = arith.constant 0 : index
    %21 = vector.load %arg4[%c0_9, %c0_10] : memref<256x128xbf16, #tpu.memory_space<vmem>>, vector<256x128xbf16>
    %cst_11 = arith.constant dense<0.000000e+00> : vector<64x128xf32>
    %22 = tpu.matmul %20, %21, %cst_11 {dimension_numbers = #tpu.dot_dimension_numbers<[1], [0], [0], [1], [0, 0, 1, 1], [], []>} : vector<64x256xbf16>, vector<256x128xbf16>, vector<64x128xf32> -> vector<64x128xf32>
    %c0_12 = arith.constant 0 : index
    %c0_13 = arith.constant 0 : index
    %23 = vector.load %arg5[%c0_12, %c0_13] : memref<1x128xf32, #tpu.memory_space<vmem>>, vector<1x128xf32>
    %24 = vector.broadcast %23 : vector<1x128xf32> to vector<64x128xf32>
    %25 = arith.addf %22, %24 : vector<64x128xf32>
    %26 = arith.addf %25, %0 : vector<64x128xf32>
    %c0_14 = arith.constant 0 : index
    %c0_15 = arith.constant 0 : index
    %27 = vector.load %arg6[%c0_14, %c0_15] : memref<64x128xf32, #tpu.memory_space<vmem>>, vector<64x128xf32>
    tpu.vector_store %arg6[%c0_14, %c0_15], %26 {strides = array<i32>} : memref<64x128xf32, #tpu.memory_space<vmem>>, vector<64x128xf32>,
    return
  }
  func.func @transform_0(%arg0: i32) -> (i32, i32) {
    %c0_i32 = arith.constant 0 : i32
    %c0_i32_0 = arith.constant 0 : i32
    return %arg0, %c0_i32 : i32, i32
  }
  func.func @transform_1(%arg0: i32) -> (i32, i32) {
    %c0_i32 = arith.constant 0 : i32
    %c0_i32_0 = arith.constant 0 : i32
    %c0_i32_1 = arith.constant 0 : i32
    return %c0_i32, %c0_i32_0 : i32, i32
  }
  func.func @transform_2(%arg0: i32) -> (i32, i32) {
    %c0_i32 = arith.constant 0 : i32
    %c0_i32_0 = arith.constant 0 : i32
    %c0_i32_1 = arith.constant 0 : i32
    return %c0_i32, %c0_i32_0 : i32, i32
  }
  func.func @transform_3(%arg0: i32) -> (i32, i32) {
    %c0_i32 = arith.constant 0 : i32
    %c0_i32_0 = arith.constant 0 : i32
    %c0_i32_1 = arith.constant 0 : i32
    return %c0_i32, %c0_i32_0 : i32, i32
  }
  func.func @transform_4(%arg0: i32) -> (i32, i32) {
    %c0_i32 = arith.constant 0 : i32
    %c0_i32_0 = arith.constant 0 : i32
    %c0_i32_1 = arith.constant 0 : i32
    return %c0_i32, %c0_i32_0 : i32, i32
  }
  func.func @transform_5(%arg0: i32) -> (i32, i32) {
    %c0_i32 = arith.constant 0 : i32
    %c0_i32_0 = arith.constant 0 : i32
    return %arg0, %c0_i32 : i32, i32
  }
}

</mosaic_0001>

<bundles_post_ra>
// kernel: image_forward.1
= control target key start
LH: loop header
LB: loop body
LE: loop exit
PB: predicated region body
PF: predicated region fallthrough
CT: control target
= control target key end

     0   :  { %10 = vsyncpa [#allocation3], 0  ;;  %s1122_s0 = inlined_call_operand.hbm [shape: f32[64,128], index: 0, kind: input, shape index: {}]   ;;  %s1123_s1 = inlined_call_operand.hbm [shape: bf16[128,256], index: 1, kind: input, shape index: {}]   ;;  %s1124_s2 = inlined_call_operand.vmem [shape: f32[1,256], index: 2, kind: input, shape index: {}]   ;;  %s1125_s3 = inlined_call_operand.hbm [shape: bf16[256,128], index: 3, kind: input, shape index: {}]   ;;  %s1126_s4 = inlined_call_operand.vmem [shape: f32[1,128], index: 4, kind: input, shape index: {}]   ;;  %s1127_s5 = inlined_call_operand.hbm [shape: f32[64,128], index: 5, kind: output, shape index: {}]  }
   0x1   :  { %11 = vsyncpa [#allocation6], 0 }
   0x2   :  { %12 = vsyncpa [#allocation4], 0  ;;  %s30_s20 = sshll.u32 %s1123_s1, 4  ;;  %s921_s21 = smov [#allocation5]   ;;  %s31_s20 = int_to_ptr.hbm [resolvable:$true] %s30_s20 }
   0x3   :  { %s32_s22 = sshll.u32 %s921_s21, 4  ;;  %s17_s25 = sshll.u32 %s1122_s0, 4  ;;  %s33_s22 = int_to_ptr.vmem [resolvable:$true] %s32_s22  ;;  %s18_s25 = int_to_ptr.hbm [resolvable:$true] %s17_s25 }
   0x4   :  { %s922_s26 = smov 128   ;;  %s923_s27 = smov 8  }
   0x5   :  { %38 = dma.hbm_to_vmem [thread:$0]  %s31_s20, 2048, %s33_s22, [#allocation6], %s922_s26, %s922_s26, %s923_s27  }
   0x6   :  { %s924_s28 = smov [#allocation2]   ;;  %s45_s1 = sshll.u32 %s1125_s3, 4  ;;  %s46_s1 = int_to_ptr.hbm [resolvable:$true] %s45_s1 }
   0x7   :  { %s19_s29 = sshll.u32 %s924_s28, 4  ;;  %s925_s0 = smov [#allocation7]   ;;  %s20_s29 = int_to_ptr.vmem [resolvable:$true] %s19_s29 }
   0x8   :  { %25 = dma.hbm_to_vmem [thread:$0]  %s18_s25, 1024, %s20_s29, [#allocation3], %s922_s26, %s922_s26, %s923_s27  }
   0x9   :  { %s47_s7 = sshll.u32 %s925_s0, 4  ;;  %s926_s8 = smov 64   ;;  %s48_s7 = int_to_ptr.vmem [resolvable:$true] %s47_s7 }
   0xa   :  { %s927_s9 = smov 4  }
   0xb   :  { %53 = dma.hbm_to_vmem [thread:$0]  %s46_s1, 2048, %s48_s7, [#allocation6], %s926_s8, %s926_s8, %s927_s9  }
   0xc   :  { %915 = dma.done.wait [#allocation3], 1024  }
   0xd   :  { %916 = vsyncadd [#allocation3], 4294966272 }
   0xe   :  { %917 = dma.done.wait [#allocation6], 4096  }
   0xf   :  { %918 = vsyncadd [#allocation6], 4294963200  ;;  %v676_v0 = vld [vmem:[#allocation5 + $0x70] sm:$0xf]  ;;  %v761_v1 = vld [vmem:[#allocation5 + $0x74] sm:$0xf0] }
  0x10   :  { %v760_v2 = vld [vmem:[#allocation5 + $0x74] sm:$0xf]  ;;  %v677_v3 = vor.u32 %v761_v1, %v676_v0  ;;  %v678_v4 = vld [vmem:[#allocation5 + $0x78] sm:$0xf0]  ;;  %v668_v5 = vld [vmem:[#allocation5 + $0x60] sm:$0xf] }
  0x11   :  { %v759_v6 = vld [vmem:[#allocation5 + $0x64] sm:$0xf0]  ;;  %v681_v7 = vor.u32 %v760_v2, %v678_v4  ;;  %v758_v8 = vld [vmem:[#allocation5 + $0x64] sm:$0xf]  ;;  %v670_v9 = vld [vmem:[#allocation5 + $0x68] sm:$0xf0] }
  0x12   :  { %182 = vmatpush.bf16.msra.mxu0 %v677_v3  ;;  %v669_v10 = vor.u32 %v759_v6, %v668_v5  ;;  %v673_v11 = vor.u32 %v758_v8, %v670_v9  ;;  %v660_v12 = vld [vmem:[#allocation5 + $0x50] sm:$0xf]  ;;  %v757_v13 = vld [vmem:[#allocation5 + $0x54] sm:$0xf0]  ;;  %v756_v14 = vld [vmem:[#allocation5 + $0x54] sm:$0xf] }
  0x13   :  { %211 = vmatpush.bf16.msra.mxu1 %v681_v7  ;;  %v662_v15 = vld [vmem:[#allocation5 + $0x58] sm:$0xf0]  ;;  %v661_v16 = vor.u32 %v757_v13, %v660_v12  ;;  %v652_v18 = vld [vmem:[#allocation5 + $0x40] sm:$0xf]  ;;  %v755_v19 = vld [vmem:[#allocation5 + $0x44] sm:$0xf0] }
  0x14   :  { %v665_v17 = vor.u32 %v756_v14, %v662_v15  ;;  %v754_v20 = vld [vmem:[#allocation5 + $0x44] sm:$0xf]  ;;  %v654_v21 = vld [vmem:[#allocation5 + $0x48] sm:$0xf0]  ;;  %v653_v22 = vor.u32 %v755_v19, %v652_v18  ;;  %v644_v24 = vld [vmem:[#allocation5 + $0x30] sm:$0xf] }
  0x15   :  { %v657_v23 = vor.u32 %v754_v20, %v654_v21  ;;  %v753_v25 = vld [vmem:[#allocation5 + $0x34] sm:$0xf0]  ;;  %v752_v26 = vld [vmem:[#allocation5 + $0x34] sm:$0xf]  ;;  %v646_v27 = vld [vmem:[#allocation5 + $0x38] sm:$0xf0] }
  0x16   :  { %183 = vmatpush.bf16.msra.mxu0 %v669_v10  ;;  %v645_v28 = vor.u32 %v753_v25, %v644_v24  ;;  %v649_v29 = vor.u32 %v752_v26, %v646_v27  ;;  %v636_v30 = vld [vmem:[#allocation5 + $0x20] sm:$0xf]  ;;  %v751_v31 = vld [vmem:[#allocation5 + $0x24] sm:$0xf0]  ;;  %v750_v32 = vld [vmem:[#allocation5 + $0x24] sm:$0xf] }
  0x17   :  { %212 = vmatpush.bf16.msra.mxu1 %v673_v11  ;;  %v638_v33 = vld [vmem:[#allocation5 + $0x28] sm:$0xf0]  ;;  %v637_v34 = vor.u32 %v751_v31, %v636_v30  ;;  %v628_v36 = vld [vmem:[#allocation5 + $0x10] sm:$0xf]  ;;  %v749_v37 = vld [vmem:[#allocation5 + $0x14] sm:$0xf0] }
  0x18   :  { %v641_v35 = vor.u32 %v750_v32, %v638_v33  ;;  %v748_v38 = vld [vmem:[#allocation5 + $0x14] sm:$0xf]  ;;  %v630_v39 = vld [vmem:[#allocation5 + $0x18] sm:$0xf0]  ;;  %v629_v40 = vor.u32 %v749_v37, %v628_v36  ;;  %v620_v42 = vld [vmem:[#allocation5] sm:$0xf] }
  0x19   :  { %v633_v41 = vor.u32 %v748_v38, %v630_v39  ;;  %v747_v43 = vld [vmem:[#allocation5 + $0x4] sm:$0xf0]  ;;  %v746_v44 = vld [vmem:[#allocation5 + $0x4] sm:$0xf]  ;;  %v622_v45 = vld [vmem:[#allocation5 + $0x8] sm:$0xf0] }
  0x1a   :  { %184 = vmatpush.bf16.msra.mxu0 %v661_v16  ;;  %v621_v46 = vor.u32 %v747_v43, %v620_v42  ;;  %v974_v47 = vld [vmem:[#allocation2] sm:$0xff]  ;;  %v976_v48 = vld [vmem:[#allocation2 + $0x8] sm:$0xff]  ;;  %v625_v49 = vor.u32 %v746_v44, %v622_v45  ;;  %v980_v51 = vld [vmem:[#allocation2 + $0x10] sm:$0xff]  ;;  %s604_s15 = sshll.u32 %s1127_s5, 4  ;;  %s605_s15 = int_to_ptr.hbm [resolvable:$true] %s604_s15 }
  0x1b   :  { %213 = vmatpush.bf16.msra.mxu1 %v665_v17  ;;  %v76_v50 = vpack.c.bf16 %v976_v48, %v974_v47  ;;  %v982_v52 = vld [vmem:[#allocation2 + $0x18] sm:$0xff]  ;;  %v986_v54 = vld [vmem:[#allocation2 + $0x20] sm:$0xff]  ;;  %v988_v55 = vld [vmem:[#allocation2 + $0x28] sm:$0xff] }
  0x1c   :  { %v77_v53 = vpack.c.bf16 %v982_v52, %v980_v51  ;;  %v78_v56 = vpack.c.bf16 %v988_v55, %v986_v54  ;;  %v992_v57 = vld [vmem:[#allocation2 + $0x30] sm:$0xff]  ;;  %v994_v58 = vld [vmem:[#allocation2 + $0x38] sm:$0xff]  ;;  %v767_v0 = vld [vmem:[#allocation7 + $0x28] sm:$0xff] }
  0x1d   :  { %v79_v59 = vpack.c.bf16 %v994_v58, %v992_v57  ;;  %v769_v60 = vld [vmem:[#allocation7 + $0x38] sm:$0xff]  ;;  %v768_v62 = vld [vmem:[#allocation7 + $0x30] sm:$0xff]  ;;  %v775_v1 = vld [vmem:[#allocation7 + $0x68] sm:$0xff] }
  0x1e   :  { %185 = vmatpush.bf16.msra.mxu0 %v653_v22  ;;  %v777_v61 = vld [vmem:[#allocation7 + $0x78] sm:$0xff]  ;;  %524 = vmatpush.bf16.msra.mxu2 %v769_v60  ;;  %v776_v63 = vld [vmem:[#allocation7 + $0x70] sm:$0xff]  ;;  %v766_v2 = vld [vmem:[#allocation7 + $0x20] sm:$0xff] }
  0x1f   :  { %214 = vmatpush.bf16.msra.mxu1 %v657_v23  ;;  %553 = vmatpush.bf16.msra.mxu3 %v777_v61  ;;  %v774_v3 = vld [vmem:[#allocation7 + $0x60] sm:$0xff]  ;;  %v765_v4 = vld [vmem:[#allocation7 + $0x18] sm:$0xff]  ;;  %v764_v6 = vld [vmem:[#allocation7 + $0x10] sm:$0xff] }
  0x20   :  { %v773_v5 = vld [vmem:[#allocation7 + $0x58] sm:$0xff]  ;;  %v772_v7 = vld [vmem:[#allocation7 + $0x50] sm:$0xff]  ;;  %v96_v8 = vld [vmem:[%s1124_s2] sm:$0x3] }
  0x21   :  { %v763_v9 = vld [vmem:[#allocation7 + $0x8] sm:$0xff]  ;;  %v1001_v11 = vperm.slane %v96_v8, 0  ;;  %v1003_v12 = vperm.slane %v96_v8, 1  ;;  %v762_v14 = vld [vmem:[#allocation7] sm:$0xff] }
  0x22   :  { %186 = vmatpush.bf16.msra.mxu0 %v645_v28  ;;  %525 = vmatpush.bf16.msra.mxu2 %v768_v62  ;;  %v771_v10 = vld [vmem:[#allocation7 + $0x48] sm:$0xff]  ;;  %v770_v15 = vld [vmem:[#allocation7 + $0x40] sm:$0xff] }
  0x23   :  { %215 = vmatpush.bf16.msra.mxu1 %v649_v29  ;;  %554 = vmatpush.bf16.msra.mxu3 %v776_v63 }
  0x26   :  { %187 = vmatpush.bf16.msra.mxu0 %v637_v34  ;;  %526 = vmatpush.bf16.msra.mxu2 %v767_v0 }
  0x27   :  { %216 = vmatpush.bf16.msra.mxu1 %v641_v35  ;;  %555 = vmatpush.bf16.msra.mxu3 %v775_v1 }
  0x2a   :  { %188 = vmatpush.bf16.msra.mxu0 %v629_v40  ;;  %527 = vmatpush.bf16.msra.mxu2 %v766_v2 }
  0x2b   :  { %217 = vmatpush.bf16.msra.mxu1 %v633_v41  ;;  %556 = vmatpush.bf16.msra.mxu3 %v774_v3 }
  0x2e   :  { %189 = vmatpush.bf16.msra.mxu0 %v621_v46  ;;  %528 = vmatpush.bf16.msra.mxu2 %v765_v4 }
  0x2f   :  { %218 = vmatpush.bf16.msra.mxu1 %v625_v49  ;;  %557 = vmatpush.bf16.msra.mxu3 %v773_v5 }
  0x31   :  { %190 = vmatmul.bf16.vlgmr.msra.gmra.mxu0 %v76_v50 }
  0x32   :  { %219 = vmatmul.bf16.vlgmr.msra.gmra.mxu1 %v76_v50  ;;  %529 = vmatpush.bf16.msra.mxu2 %v764_v6 }
  0x33   :  { %558 = vmatpush.bf16.msra.mxu3 %v772_v7 }
  0x36   :  { %530 = vmatpush.bf16.msra.mxu2 %v763_v9 }
  0x37   :  { %559 = vmatpush.bf16.msra.mxu3 %v771_v10 }
  0x3a   :  { %531 = vmatpush.bf16.msra.mxu2 %v762_v14 }
  0x3b   :  { %560 = vmatpush.bf16.msra.mxu3 %v770_v15 }
  0x41   :  { %195 = vmatmul.bf16.gmra.mxu0 %v77_v53 }
  0x42   :  { %224 = vmatmul.bf16.gmra.mxu1 %v77_v53 }
  0x51   :  { %200 = vmatmul.bf16.gmra.mxu0 %v78_v56 }
  0x52   :  { %229 = vmatmul.bf16.gmra.mxu1 %v78_v56 }
  0x61   :  { %205 = vmatmul.bf16.gmra.mxu0 %v79_v59 }
  0x62   :  { %234 = vmatmul.bf16.gmra.mxu1 %v79_v59 }
  0xae   :  { %v191_v13 = vpop.f32.mrf.mxu0 }
  0xaf   :  { %v1006_v16 = vadd.f32 %v191_v13, %v1001_v11  ;;  %v220_v17 = vpop.f32.mrf.mxu1 }
  0xb0   :  { %v1009_v18 = vadd.f32 %v220_v17, %v1003_v12 }
  0xb1   :  { %v240_v19 = vmul.f32 %v1006_v16, %v1006_v16 }
  0xb2   :  { %v241_v20 = vmul.f32 %v1009_v18, %v1009_v18 }
  0xb3   :  { %v256_v21 = vmul.f32 %v240_v19, %v1006_v16 }
  0xb4   :  { %v257_v22 = vmul.f32 %v241_v20, %v1009_v18 }
  0xb5   :  { %v272_v23 = vmul.f32 0.044715, %v256_v21 }
  0xb6   :  { %v273_v24 = vmul.f32 0.044715, %v257_v22  ;;  %v193_v25 = vpop.f32.mrf.mxu0 }
  0xb7   :  { %v288_v26 = vadd.f32 %v272_v23, %v1006_v16  ;;  %v194_v27 = vadd.f32 %v193_v25, %v1001_v11  ;;  %v222_v28 = vpop.f32.mrf.mxu1 }
  0xb8   :  { %v289_v29 = vadd.f32 %v273_v24, %v1009_v18  ;;  %v223_v30 = vadd.f32 %v222_v28, %v1003_v12 }
  0xb9   :  { %v242_v31 = vmul.f32 %v194_v27, %v194_v27  ;;  %v304_v32 = vmul.f32 0.7978846, %v288_v26 }
  0xba   :  { %v243_v33 = vmul.f32 %v223_v30, %v223_v30  ;;  %v305_v34 = vmul.f32 0.7978846, %v289_v29 }
  0xbb   :  { %v258_v35 = vmul.f32 %v242_v31, %v194_v27  ;;  %787 = vtanh.f32 %v304_v32 }
  0xbc   :  { %v259_v36 = vmul.f32 %v243_v33, %v223_v30  ;;  %789 = vtanh.f32 %v305_v34 }
  0xbd   :  { %v274_v37 = vmul.f32 0.044715, %v258_v35 }
  0xbe   :  { %v275_v38 = vmul.f32 0.044715, %v259_v36  ;;  %v196_v39 = vpop.f32.mrf.mxu0 }
  0xbf   :  { %v290_v40 = vadd.f32 %v274_v37, %v194_v27  ;;  %v1022_v41 = vadd.f32 %v196_v39, %v1001_v11  ;;  %v225_v42 = vpop.f32.mrf.mxu1 }
  0xc0   :  { %v291_v43 = vadd.f32 %v275_v38, %v223_v30  ;;  %v1025_v44 = vadd.f32 %v225_v42, %v1003_v12 }
  0xc1   :  { %v244_v45 = vmul.f32 %v1022_v41, %v1022_v41  ;;  %v306_v46 = vmul.f32 0.7978846, %v290_v40  ;;  %v788_v53 = vpop.eup %787 }
  0xc2   :  { %v245_v49 = vmul.f32 %v1025_v44, %v1025_v44  ;;  %v307_v50 = vmul.f32 0.7978846, %v291_v43  ;;  %v790_v59 = vpop.eup %789  ;;  %v336_v0 = vadd.f32 1.0, %v788_v53 }
  0xc3   :  { %v260_v56 = vmul.f32 %v244_v45, %v1022_v41  ;;  %791 = vtanh.f32 %v306_v46  ;;  %v337_v4 = vadd.f32 1.0, %v790_v59 }
  0xc4   :  { %v261_v60 = vmul.f32 %v245_v49, %v1025_v44  ;;  %793 = vtanh.f32 %v307_v50  ;;  %v352_v15 = vmul.f32 0.5, %v336_v0 }
  0xc5   :  { %v276_v61 = vmul.f32 0.044715, %v260_v56  ;;  %v353_v21 = vmul.f32 0.5, %v337_v4 }
  0xc6   :  { %v277_v62 = vmul.f32 0.044715, %v261_v60  ;;  %v198_v63 = vpop.f32.mrf.mxu0  ;;  %v368_v29 = vmul.f32 %v352_v15, %v1006_v16 }
  0xc7   :  { %v292_v1 = vadd.f32 %v276_v61, %v1022_v41  ;;  %v1035_v2 = vadd.f32 %v198_v63, %v1001_v11  ;;  %v227_v3 = vpop.f32.mrf.mxu1  ;;  %v369_v35 = vmul.f32 %v353_v21, %v1009_v18 }
  0xc8   :  { %v293_v5 = vadd.f32 %v277_v62, %v1025_v44  ;;  %v1039_v6 = vadd.f32 %v227_v3, %v1003_v12 }
  0xc9   :  { %v792_v7 = vpop.eup %791  ;;  %v246_v8 = vmul.f32 %v1035_v2, %v1035_v2  ;;  %v308_v9 = vmul.f32 0.7978846, %v292_v1 }
  0xca   :  { %v794_v10 = vpop.eup %793  ;;  %v247_v13 = vmul.f32 %v1039_v6, %v1039_v6  ;;  %v338_v14 = vadd.f32 1.0, %v792_v7  ;;  %v309_v17 = vmul.f32 0.7978846, %v293_v5 }
  0xcb   :  { %v262_v19 = vmul.f32 %v246_v8, %v1035_v2  ;;  %v339_v20 = vadd.f32 1.0, %v794_v10  ;;  %795 = vtanh.f32 %v308_v9 }
  0xcc   :  { %v263_v22 = vmul.f32 %v247_v13, %v1039_v6  ;;  %v354_v23 = vmul.f32 0.5, %v338_v14  ;;  %797 = vtanh.f32 %v309_v17 }
  0xcd   :  { %v278_v24 = vmul.f32 0.044715, %v262_v19  ;;  %v355_v25 = vmul.f32 0.5, %v339_v20 }
  0xce   :  { %v279_v26 = vmul.f32 0.044715, %v263_v22  ;;  %v201_v28 = vpop.f32.mrf.mxu0  ;;  %v370_v31 = vmul.f32 %v354_v23, %v194_v27 }
  0xcf   :  { %v294_v32 = vadd.f32 %v278_v24, %v1035_v2  ;;  %v1050_v33 = vadd.f32 %v201_v28, %v1001_v11  ;;  %v230_v34 = vpop.f32.mrf.mxu1  ;;  %v371_v36 = vmul.f32 %v355_v25, %v223_v30 }
  0xd0   :  { %v295_v37 = vadd.f32 %v279_v26, %v1039_v6  ;;  %v1055_v38 = vadd.f32 %v230_v34, %v1003_v12  ;;  %v384_v39 = vpack.c.bf16 %v370_v31, %v368_v29 }
  0xd1   :  { %v248_v16 = vmul.f32 %v1050_v33, %v1050_v33  ;;  %v385_v27 = vpack.c.bf16 %v371_v36, %v369_v35  ;;  %v310_v40 = vmul.f32 0.7978846, %v294_v32  ;;  %v796_v45 = vpop.eup %795 }
  0xd2   :  { %v249_v42 = vmul.f32 %v1055_v38, %v1055_v38  ;;  %532 = vmatmul.bf16.vlgmr.msra.gmra.mxu2 %v384_v39  ;;  %v311_v43 = vmul.f32 0.7978846, %v295_v37  ;;  %v798_v30 = vpop.eup %797  ;;  %v340_v56 = vadd.f32 1.0, %v796_v45 }
  0xd3   :  { %v264_v18 = vmul.f32 %v248_v16, %v1050_v33  ;;  %561 = vmatmul.bf16.vlgmr.msra.gmra.mxu3 %v385_v27  ;;  %799 = vtanh.f32 %v310_v40  ;;  %v341_v62 = vadd.f32 1.0, %v798_v30 }
  0xd4   :  { %v265_v46 = vmul.f32 %v249_v42, %v1055_v38  ;;  %801 = vtanh.f32 %v311_v43  ;;  %v356_v9 = vmul.f32 0.5, %v340_v56 }
  0xd5   :  { %v280_v49 = vmul.f32 0.044715, %v264_v18  ;;  %v357_v15 = vmul.f32 0.5, %v341_v62 }
  0xd6   :  { %v281_v50 = vmul.f32 0.044715, %v265_v46  ;;  %v203_v53 = vpop.f32.mrf.mxu0  ;;  %v372_v24 = vmul.f32 %v356_v9, %v1022_v41 }
  0xd7   :  { %v296_v59 = vadd.f32 %v280_v49, %v1050_v33  ;;  %v1065_v60 = vadd.f32 %v203_v53, %v1001_v11  ;;  %v232_v61 = vpop.f32.mrf.mxu1  ;;  %v373_v31 = vmul.f32 %v357_v15, %v1025_v44 }
  0xd8   :  { %v297_v63 = vadd.f32 %v281_v50, %v1055_v38  ;;  %v1069_v0 = vadd.f32 %v232_v61, %v1003_v12 }
  0xd9   :  { %v800_v1 = vpop.eup %799  ;;  %v250_v3 = vmul.f32 %v1065_v60, %v1065_v60  ;;  %v312_v4 = vmul.f32 0.7978846, %v296_v59 }
  0xda   :  { %v802_v5 = vpop.eup %801  ;;  %v251_v7 = vmul.f32 %v1069_v0, %v1069_v0  ;;  %v342_v8 = vadd.f32 1.0, %v800_v1  ;;  %v313_v10 = vmul.f32 0.7978846, %v297_v63 }
  0xdb   :  { %v266_v13 = vmul.f32 %v250_v3, %v1065_v60  ;;  %v343_v14 = vadd.f32 1.0, %v802_v5  ;;  %803 = vtanh.f32 %v312_v4 }
  0xdc   :  { %v267_v17 = vmul.f32 %v251_v7, %v1069_v0  ;;  %v358_v19 = vmul.f32 0.5, %v342_v8  ;;  %805 = vtanh.f32 %v313_v10 }
  0xdd   :  { %v282_v20 = vmul.f32 0.044715, %v266_v13  ;;  %v359_v21 = vmul.f32 0.5, %v343_v14 }
  0xde   :  { %v283_v22 = vmul.f32 0.044715, %v267_v17  ;;  %v206_v23 = vpop.f32.mrf.mxu0  ;;  %v374_v25 = vmul.f32 %v358_v19, %v1035_v2 }
  0xdf   :  { %v298_v26 = vadd.f32 %v282_v20, %v1065_v60  ;;  %v1081_v28 = vadd.f32 %v206_v23, %v1001_v11  ;;  %v235_v29 = vpop.f32.mrf.mxu1  ;;  %v375_v32 = vmul.f32 %v359_v21, %v1039_v6 }
  0xe0   :  { %v299_v34 = vadd.f32 %v283_v22, %v1069_v0  ;;  %v1087_v35 = vadd.f32 %v235_v29, %v1003_v12  ;;  %v386_v36 = vpack.c.bf16 %v374_v25, %v372_v24 }
  0xe1   :  { %v252_v41 = vmul.f32 %v1081_v28, %v1081_v28  ;;  %v387_v2 = vpack.c.bf16 %v375_v32, %v373_v31  ;;  %v314_v37 = vmul.f32 0.7978846, %v298_v26  ;;  %v804_v27 = vpop.eup %803 }
  0xe2   :  { %v253_v39 = vmul.f32 %v1087_v35, %v1087_v35  ;;  %537 = vmatmul.bf16.gmra.mxu2 %v386_v36  ;;  %v315_v16 = vmul.f32 0.7978846, %v299_v34  ;;  %v806_v6 = vpop.eup %805  ;;  %v344_v18 = vadd.f32 1.0, %v804_v27 }
  0xe3   :  { %v268_v44 = vmul.f32 %v252_v41, %v1081_v28  ;;  %566 = vmatmul.bf16.gmra.mxu3 %v387_v2  ;;  %807 = vtanh.f32 %v314_v37  ;;  %v345_v50 = vadd.f32 1.0, %v806_v6 }
  0xe4   :  { %v269_v40 = vmul.f32 %v253_v39, %v1087_v35  ;;  %809 = vtanh.f32 %v315_v16  ;;  %v360_v4 = vmul.f32 0.5, %v344_v18 }
  0xe5   :  { %v284_v42 = vmul.f32 0.044715, %v268_v44  ;;  %v361_v9 = vmul.f32 0.5, %v345_v50 }
  0xe6   :  { %v285_v43 = vmul.f32 0.044715, %v269_v40  ;;  %v208_v45 = vpop.f32.mrf.mxu0  ;;  %v376_v17 = vmul.f32 %v360_v4, %v1050_v33 }
  0xe7   :  { %v300_v30 = vadd.f32 %v284_v42, %v1081_v28  ;;  %v209_v46 = vadd.f32 %v208_v45, %v1001_v11  ;;  %v237_v49 = vpop.f32.mrf.mxu1  ;;  %v377_v20 = vmul.f32 %v361_v9, %v1055_v38  ;;  %v786_v42 = vld [vmem:[%s1126_s4] ss:$0 sm:$0xff]  ;;  %s928_s4 = smov [#allocation8]  }
  0xe8   :  { %v301_v53 = vadd.f32 %v285_v43, %v1087_v35  ;;  %v238_v56 = vadd.f32 %v237_v49, %v1003_v12  ;;  %s602_s12 = sshll.u32 %s928_s4, 4  ;;  %s603_s12 = int_to_ptr.vmem [resolvable:$true] %s602_s12 }
  0xe9   :  { %v808_v59 = vpop.eup %807  ;;  %v254_v61 = vmul.f32 %v209_v46, %v209_v46  ;;  %v316_v62 = vmul.f32 0.7978846, %v300_v30 }
  0xea   :  { %v810_v63 = vpop.eup %809  ;;  %v255_v1 = vmul.f32 %v238_v56, %v238_v56  ;;  %v346_v3 = vadd.f32 1.0, %v808_v59  ;;  %v317_v5 = vmul.f32 0.7978846, %v301_v53 }
  0xeb   :  { %v270_v7 = vmul.f32 %v254_v61, %v209_v46  ;;  %v347_v8 = vadd.f32 1.0, %v810_v63  ;;  %811 = vtanh.f32 %v316_v62 }
  0xec   :  { %v271_v10 = vmul.f32 %v255_v1, %v238_v56  ;;  %v362_v13 = vmul.f32 0.5, %v346_v3  ;;  %813 = vtanh.f32 %v317_v5 }
  0xed   :  { %v286_v11 = vmul.f32 0.044715, %v270_v7  ;;  %v363_v14 = vmul.f32 0.5, %v347_v8 }
  0xee   :  { %v287_v15 = vmul.f32 0.044715, %v271_v10  ;;  %v378_v12 = vmul.f32 %v362_v13, %v1065_v60 }
  0xef   :  { %v302_v19 = vadd.f32 %v286_v11, %v209_v46  ;;  %v379_v21 = vmul.f32 %v363_v14, %v1069_v0 }
  0xf0   :  { %v303_v22 = vadd.f32 %v287_v15, %v238_v56  ;;  %v388_v23 = vpack.c.bf16 %v378_v12, %v376_v17 }
  0xf1   :  { %v389_v24 = vpack.c.bf16 %v379_v21, %v377_v20  ;;  %v318_v25 = vmul.f32 0.7978846, %v302_v19  ;;  %v812_v29 = vpop.eup %811 }
  0xf2   :  { %542 = vmatmul.bf16.gmra.mxu2 %v388_v23  ;;  %v319_v26 = vmul.f32 0.7978846, %v303_v22  ;;  %v814_v31 = vpop.eup %813  ;;  %v348_v33 = vadd.f32 1.0, %v812_v29 }
  0xf3   :  { %571 = vmatmul.bf16.gmra.mxu3 %v389_v24  ;;  %815 = vtanh.f32 %v318_v25  ;;  %v349_v32 = vadd.f32 1.0, %v814_v31 }
  0xf4   :  { %817 = vtanh.f32 %v319_v26  ;;  %v364_v41 = vmul.f32 0.5, %v348_v33 }
  0xf5   :  { %v365_v2 = vmul.f32 0.5, %v349_v32 }
  0xf6   :  { %v380_v39 = vmul.f32 %v364_v41, %v1081_v28 }
  0xf7   :  { %v381_v27 = vmul.f32 %v365_v2, %v1087_v35 }
  0xf9   :  { %v816_v60 = vpop.eup %815 }
  0xfa   :  { %v818_v34 = vpop.eup %817  ;;  %v350_v36 = vadd.f32 1.0, %v816_v60 }
  0xfb   :  { %v351_v38 = vadd.f32 1.0, %v818_v34 }
  0xfc   :  { %v366_v0 = vmul.f32 0.5, %v350_v36 }
  0xfd   :  { %v367_v37 = vmul.f32 0.5, %v351_v38 }
  0xfe   :  { %v382_v16 = vmul.f32 %v366_v0, %v209_v46 }
  0xff   :  { %v383_v44 = vmul.f32 %v367_v37, %v238_v56 }
 0x100   :  { %v390_v6 = vpack.c.bf16 %v382_v16, %v380_v39 }
 0x101   :  { %v391_v40 = vpack.c.bf16 %v383_v44, %v381_v27 }
 0x102   :  { %547 = vmatmul.bf16.gmra.mxu2 %v390_v6 }
 0x103   :  { %576 = vmatmul.bf16.gmra.mxu3 %v391_v40 }
 0x155   :  { %v533_v43 = vpop.f32.mrf.mxu2 }
 0x156   :  { %v534_v45 = vadd.f32 %v786_v42, %v533_v43  ;;  %v562_v18 = vpop.f32.mrf.mxu3 }
 0x158   :  { %v563_v30 = vadd.f32 %v562_v18, %v534_v45 }
 0x15a   :  { %v582_v49 = vadd.f32 %v563_v30, %v974_v47 }
 0x15c   :  { %590 = vst [vmem:[#allocation8] sm:$0xff] %v582_v49 }
 0x15d   :  { %v535_v28 = vpop.f32.mrf.mxu2 }
 0x15e   :  { %v536_v46 = vadd.f32 %v786_v42, %v535_v28  ;;  %v564_v50 = vpop.f32.mrf.mxu3 }
 0x160   :  { %v565_v35 = vadd.f32 %v564_v50, %v536_v46 }
 0x162   :  { %v583_v53 = vadd.f32 %v565_v35, %v976_v48 }
 0x164   :  { %591 = vst [vmem:[#allocation8 + $0x8] sm:$0xff] %v583_v53 }
 0x165   :  { %v538_v56 = vpop.f32.mrf.mxu2 }
 0x166   :  { %v539_v59 = vadd.f32 %v786_v42, %v538_v56  ;;  %v567_v61 = vpop.f32.mrf.mxu3 }
 0x168   :  { %v568_v62 = vadd.f32 %v567_v61, %v539_v59 }
 0x16a   :  { %v584_v63 = vadd.f32 %v568_v62, %v980_v51 }
 0x16c   :  { %592 = vst [vmem:[#allocation8 + $0x10] sm:$0xff] %v584_v63 }
 0x16d   :  { %v540_v1 = vpop.f32.mrf.mxu2 }
 0x16e   :  { %v541_v3 = vadd.f32 %v786_v42, %v540_v1  ;;  %v569_v4 = vpop.f32.mrf.mxu3 }
 0x170   :  { %v570_v5 = vadd.f32 %v569_v4, %v541_v3 }
 0x172   :  { %v585_v47 = vadd.f32 %v570_v5, %v982_v52 }
 0x174   :  { %593 = vst [vmem:[#allocation8 + $0x18] sm:$0xff] %v585_v47 }
 0x175   :  { %v543_v7 = vpop.f32.mrf.mxu2 }
 0x176   :  { %v544_v8 = vadd.f32 %v786_v42, %v543_v7  ;;  %v572_v9 = vpop.f32.mrf.mxu3 }
 0x178   :  { %v573_v10 = vadd.f32 %v572_v9, %v544_v8 }
 0x17a   :  { %v586_v48 = vadd.f32 %v573_v10, %v986_v54 }
 0x17c   :  { %594 = vst [vmem:[#allocation8 + $0x20] sm:$0xff] %v586_v48 }
 0x17d   :  { %v545_v13 = vpop.f32.mrf.mxu2 }
 0x17e   :  { %v546_v11 = vadd.f32 %v786_v42, %v545_v13  ;;  %v574_v14 = vpop.f32.mrf.mxu3 }
 0x180   :  { %v575_v15 = vadd.f32 %v574_v14, %v546_v11 }
 0x182   :  { %v587_v51 = vadd.f32 %v575_v15, %v988_v55 }
 0x184   :  { %595 = vst [vmem:[#allocation8 + $0x28] sm:$0xff] %v587_v51 }
 0x185   :  { %v548_v17 = vpop.f32.mrf.mxu2 }
 0x186   :  { %v549_v12 = vadd.f32 %v786_v42, %v548_v17  ;;  %v577_v19 = vpop.f32.mrf.mxu3 }
 0x188   :  { %v578_v20 = vadd.f32 %v577_v19, %v549_v12 }
 0x18a   :  { %v588_v52 = vadd.f32 %v578_v20, %v992_v57 }
 0x18c   :  { %596 = vst [vmem:[#allocation8 + $0x30] sm:$0xff] %v588_v52 }
 0x18d   :  { %v550_v21 = vpop.f32.mrf.mxu2 }
 0x18e   :  { %v551_v22 = vadd.f32 %v786_v42, %v550_v21  ;;  %v579_v23 = vpop.f32.mrf.mxu3 }
 0x190   :  { %v580_v54 = vadd.f32 %v579_v23, %v551_v22 }
 0x192   :  { %v589_v55 = vadd.f32 %v580_v54, %v994_v58 }
 0x194   :  { %597 = vst [vmem:[#allocation8 + $0x38] sm:$0xff] %v589_v55 }
 0x195   :  { %610 = dma.vmem_to_hbm [thread:$0]  %s603_s12, 1024, %s605_s15, [#allocation4], %s922_s26, %s922_s26, %s923_s27  }
 0x196   :  { %919 = dma.done.wait [#allocation4], 1024  }
 0x197   :  { %920 = vsyncadd [#allocation4], 4294966272 }
 0x198   :  { %615 = vsyncpa [#allocation3], 1 }
 0x199   :  { %616 = vsyncpa [#allocation6], 1 }
 0x19a   :  { %617 = vsyncpa [#allocation4], 1 }

</bundles_post_ra>
